<compile_context>
chip_gen: v6e
topology: v6e:2x2x1
jax: 0.10.0
libtpu: 0.0.40
codegen_flags: <defaults>
</compile_context>

<pallas_src>
import numpy as np
import jax
import jax.numpy as jnp
from jax.experimental import pallas as pl
from jax.experimental.pallas import tpu as pltpu


def _round_up(x, m):
    return (x + m - 1) // m * m


def actor_mlp_kernel(x_ref,
                     w1_ref, b1_ref,
                     w2_ref, b2_ref,
                     w3_ref, b3_ref,
                     w4_ref, b4_ref,
                     w5_ref, b5_ref,
                     o_ref):
    """One batch tile: 5 chained MXU dots (bf16 operands, f32 accumulate) +
    f32 bias-add/ReLU, all VMEM-resident."""

    def dense(h_f32, w_ref, b_ref):
        # Cast activations to bf16 right before the dot; weights are already
        # bf16.  Accumulate in f32, bias-add in f32.
        acc = jnp.dot(h_f32.astype(jnp.bfloat16), w_ref[...],
                      preferred_element_type=jnp.float32)
        return acc + b_ref[...]

    h = x_ref[...].astype(jnp.float32)
    h = jnp.maximum(dense(h, w1_ref, b1_ref), 0.0)
    h = jnp.maximum(dense(h, w2_ref, b2_ref), 0.0)
    h = jnp.maximum(dense(h, w3_ref, b3_ref), 0.0)
    h = jnp.maximum(dense(h, w4_ref, b4_ref), 0.0)
    out = dense(h, w5_ref, b5_ref)

    o_ref[...] = out.astype(o_ref.dtype)


def init_params(key, in_size, hidden, out_size):
    """PyTorch-Linear-style init: U(-1/sqrt(fan_in), 1/sqrt(fan_in)).
    Weights stored as (in_features, out_features) so y = x @ W + b."""
    sizes = [(in_size, hidden), (hidden, hidden), (hidden, hidden),
             (hidden, hidden), (hidden, out_size)]
    params = []
    for (fan_in, fan_out) in sizes:
        key, kw, kb = jax.random.split(key, 3)
        bound = 1.0 / np.sqrt(fan_in)
        w = jax.random.uniform(kw, (fan_in, fan_out), jnp.float32, -bound, bound)
        b = jax.random.uniform(kb, (1, fan_out), jnp.float32, -bound, bound)
        params.append((w, b))
    return params


def pad_params(params, lane=128):
    """Zero-pad the hidden width to a multiple of `lane` (lane-dense chained
    activations) and cast weights to bf16 for the MXU.  Padded hidden units
    compute ReLU(x @ 0 + 0) = 0 and contribute exactly 0 to later dots, so
    forward semantics are unchanged.  Biases stay f32 (added to the f32
    accumulator); the final projection keeps the true out_size."""
    (w1, b1), (w2, b2), (w3, b3), (w4, b4), (w5, b5) = params
    h = w1.shape[1]
    hp = _round_up(h, lane)
    pad_c = ((0, 0), (0, hp - h))            # pad output features (columns)
    pad_r = ((0, hp - h), (0, 0))            # pad input features  (rows)
    pad_rc = ((0, hp - h), (0, hp - h))

    def wcast(w):
        return w.astype(jnp.bfloat16)

    return [
        (wcast(jnp.pad(w1, pad_c)), jnp.pad(b1, pad_c)),
        (wcast(jnp.pad(w2, pad_rc)), jnp.pad(b2, pad_c)),
        (wcast(jnp.pad(w3, pad_rc)), jnp.pad(b3, pad_c)),
        (wcast(jnp.pad(w4, pad_rc)), jnp.pad(b4, pad_c)),
        (wcast(jnp.pad(w5, pad_r)), b5),
    ]


def _choose_tile(B, tb):
    """Batch-tile selection: multiple of 8 (sublane), <= batch, and clamped so
    large batches give >= 2 grid blocks (feeds both v7x TensorCores)."""
    B8 = _round_up(B, 8)
    tb = min(tb, B8)
    if B8 >= 16 and tb > B8 // 2:
        tb = B8 // 2
    return _round_up(max(tb, 8), 8)


def actor_forward(x, padded_params, *, tb=4096):
    """Streamed batched forward.  x: (B, in_size) f32; returns (B, out_size) f32."""
    B, in_size = x.shape
    hp = padded_params[0][0].shape[1]
    out_size = padded_params[-1][0].shape[1]

    tb = _choose_tile(B, tb)
    B_pad = _round_up(B, tb)
    x_p = jnp.pad(x, ((0, B_pad - B), (0, 0))) if B_pad != B else x
    n_blocks = B_pad // tb

    # x/out stream per grid step; weights/biases are full blocks pinned at
    # (0,0) for every step, so they stay VMEM-resident across the whole grid.
    in_specs = [pl.BlockSpec((tb, in_size), lambda i: (i, 0))]
    flat = []
    for (w, b) in padded_params:
        flat.append(w)
        flat.append(b)
        in_specs.append(pl.BlockSpec(w.shape, lambda i: (0, 0)))
        in_specs.append(pl.BlockSpec(b.shape, lambda i: (0, 0)))

    flops = 2 * B_pad * sum(int(w.shape[0]) * int(w.shape[1])
                            for w, _ in padded_params)
    bytes_accessed = (4 * (int(x_p.size) + B_pad * out_size)
                      + sum(int(w.size) * w.dtype.itemsize
                            + int(b.size) * b.dtype.itemsize
                            for w, b in padded_params))

    # Explicit VMEM budget from the actual footprint (double-buffered x/out
    # tiles + resident weights/biases + chained f32/bf16 activation slabs),
    # with 2x headroom, capped below v7x's 64 MiB physical VMEM.
    weights_bytes = sum(int(w.size) * w.dtype.itemsize
                        + int(b.size) * b.dtype.itemsize
                        for w, b in padded_params)
    act_bytes = 6 * tb * hp * 4                      # chained intermediates
    io_bytes = 2 * tb * in_size * 4 + 2 * tb * out_size * 4
    vmem_limit = int(min(max(2 * (weights_bytes + act_bytes + io_bytes),
                             16 << 20), 60 << 20))

    out = pl.pallas_call(
        actor_mlp_kernel,
        out_shape=jax.ShapeDtypeStruct((B_pad, out_size), jnp.float32),
        grid=(n_blocks,),
        in_specs=in_specs,
        out_specs=pl.BlockSpec((tb, out_size), lambda i: (i, 0)),
        compiler_params=pltpu.CompilerParams(
            dimension_semantics=("parallel",),       # v7x: shard batch over 2 TCs
            vmem_limit_bytes=vmem_limit),
        cost_estimate=pl.CostEstimate(
            flops=flops, transcendentals=0, bytes_accessed=bytes_accessed),
    )(x_p, *flat)

    return out[:B]


def actor_forward_ref(x, params):
    """Pure-JAX f32 reference (unpadded params) for correctness check."""
    h = x
    for i, (w, b) in enumerate(params):
        h = h @ w + b
        if i < len(params) - 1:
            h = jnp.maximum(h, 0.0)
    return h


if __name__ == "__main__":
    key = jax.random.PRNGKey(0)

    batch = 8
    actor_in_size = 10
    actor_layer_size = 32
    actor_out_size = 3

    key, kx = jax.random.split(key)
    x = jax.random.normal(kx, (batch, actor_in_size), dtype=jnp.float32)

    params = init_params(key, actor_in_size, actor_layer_size, actor_out_size)
    padded = pad_params(params)

    # bf16 MXU operands with f32 accumulation -> looser tolerance vs f32 ref.
    RTOL, ATOL = 2e-2, 2e-2

    # Small single-tile case.
    out = jax.block_until_ready(actor_forward(x, padded))
    ref = actor_forward_ref(x, params)
    np.testing.assert_allclose(np.asarray(out), np.asarray(ref),
                               rtol=RTOL, atol=ATOL)

    # Ragged batch exercising the multi-block streamed path; _choose_tile
    # clamps the tile so the grid has >= 2 blocks (both v7x TCs loaded).
    key, kx2 = jax.random.split(key)
    x2 = jax.random.normal(kx2, (300, actor_in_size), dtype=jnp.float32)
    out2 = jax.block_until_ready(actor_forward(x2, padded, tb=128))
    ref2 = actor_forward_ref(x2, params)
    np.testing.assert_allclose(np.asarray(out2), np.asarray(ref2),
                               rtol=RTOL, atol=ATOL)

    print("KERNEL_OK")
</pallas_src>

<mosaic_0001>
module attributes {stable_mosaic.version = 11 : i64} {
  func.func @actor_mlp_kernel(%arg0: i32, %arg1: memref<8x10xf32, #tpu.memory_space<vmem>>, %arg2: memref<10x128xbf16, #tpu.memory_space<vmem>>, %arg3: memref<1x128xf32, #tpu.memory_space<vmem>>, %arg4: memref<128x128xbf16, #tpu.memory_space<vmem>>, %arg5: memref<1x128xf32, #tpu.memory_space<vmem>>, %arg6: memref<128x128xbf16, #tpu.memory_space<vmem>>, %arg7: memref<1x128xf32, #tpu.memory_space<vmem>>, %arg8: memref<128x128xbf16, #tpu.memory_space<vmem>>, %arg9: memref<1x128xf32, #tpu.memory_space<vmem>>, %arg10: memref<128x3xbf16, #tpu.memory_space<vmem>>, %arg11: memref<1x3xf32, #tpu.memory_space<vmem>>, %arg12: memref<8x3xf32, #tpu.memory_space<vmem>>) attributes {dimension_semantics = [#tpu.dimension_semantics<parallel>], iteration_bounds = array<i64: 1>, scalar_prefetch = 0 : i64, scratch_operands = 0 : i64, tpu.core_type = #tpu.core_type<tc>, window_params = [{transform_indices = @transform_0, window_bounds = array<i64: 8, 10>}, {pipeline_mode = #tpu.pipeline_mode<synchronous>, transform_indices = @transform_1, window_bounds = array<i64: 10, 128>}, {pipeline_mode = #tpu.pipeline_mode<synchronous>, transform_indices = @transform_2, window_bounds = array<i64: 1, 128>}, {pipeline_mode = #tpu.pipeline_mode<synchronous>, transform_indices = @transform_3, window_bounds = array<i64: 128, 128>}, {pipeline_mode = #tpu.pipeline_mode<synchronous>, transform_indices = @transform_4, window_bounds = array<i64: 1, 128>}, {pipeline_mode = #tpu.pipeline_mode<synchronous>, transform_indices = @transform_5, window_bounds = array<i64: 128, 128>}, {pipeline_mode = #tpu.pipeline_mode<synchronous>, transform_indices = @transform_6, window_bounds = array<i64: 1, 128>}, {pipeline_mode = #tpu.pipeline_mode<synchronous>, transform_indices = @transform_7, window_bounds = array<i64: 128, 128>}, {pipeline_mode = #tpu.pipeline_mode<synchronous>, transform_indices = @transform_8, window_bounds = array<i64: 1, 128>}, {pipeline_mode = #tpu.pipeline_mode<synchronous>, transform_indices = @transform_9, window_bounds = array<i64: 128, 3>}, {pipeline_mode = #tpu.pipeline_mode<synchronous>, transform_indices = @transform_10, window_bounds = array<i64: 1, 3>}, {transform_indices = @transform_11, window_bounds = array<i64: 8, 3>}]} {
    %c0 = arith.constant 0 : index
    %c0_0 = arith.constant 0 : index
    %0 = vector.load %arg1[%c0, %c0_0] : memref<8x10xf32, #tpu.memory_space<vmem>>, vector<8x10xf32>
    %1 = arith.truncf %0 : vector<8x10xf32> to vector<8x10xbf16>
    %c0_1 = arith.constant 0 : index
    %c0_2 = arith.constant 0 : index
    %2 = vector.load %arg2[%c0_1, %c0_2] : memref<10x128xbf16, #tpu.memory_space<vmem>>, vector<10x128xbf16>
    %cst = arith.constant dense<0.000000e+00> : vector<8x128xf32>
    %3 = tpu.matmul %1, %2, %cst {dimension_numbers = #tpu.dot_dimension_numbers<[1], [0], [0], [1], [0, 0, 1, 1], [], []>} : vector<8x10xbf16>, vector<10x128xbf16>, vector<8x128xf32> -> vector<8x128xf32>
    %c0_3 = arith.constant 0 : index
    %c0_4 = arith.constant 0 : index
    %4 = vector.load %arg3[%c0_3, %c0_4] : memref<1x128xf32, #tpu.memory_space<vmem>>, vector<1x128xf32>
    %5 = vector.broadcast %4 : vector<1x128xf32> to vector<8x128xf32>
    %6 = arith.addf %3, %5 : vector<8x128xf32>
    %cst_5 = arith.constant 0.000000e+00 : f32
    %7 = vector.broadcast %cst_5 : f32 to vector<8x128xf32>
    %8 = arith.maximumf %6, %7 : vector<8x128xf32>
    %9 = arith.truncf %8 : vector<8x128xf32> to vector<8x128xbf16>
    %c0_6 = arith.constant 0 : index
    %c0_7 = arith.constant 0 : index
    %10 = vector.load %arg4[%c0_6, %c0_7] : memref<128x128xbf16, #tpu.memory_space<vmem>>, vector<128x128xbf16>
    %cst_8 = arith.constant dense<0.000000e+00> : vector<8x128xf32>
    %11 = tpu.matmul %9, %10, %cst_8 {dimension_numbers = #tpu.dot_dimension_numbers<[1], [0], [0], [1], [0, 0, 1, 1], [], []>} : vector<8x128xbf16>, vector<128x128xbf16>, vector<8x128xf32> -> vector<8x128xf32>
    %c0_9 = arith.constant 0 : index
    %c0_10 = arith.constant 0 : index
    %12 = vector.load %arg5[%c0_9, %c0_10] : memref<1x128xf32, #tpu.memory_space<vmem>>, vector<1x128xf32>
    %13 = vector.broadcast %12 : vector<1x128xf32> to vector<8x128xf32>
    %14 = arith.addf %11, %13 : vector<8x128xf32>
    %cst_11 = arith.constant 0.000000e+00 : f32
    %15 = vector.broadcast %cst_11 : f32 to vector<8x128xf32>
    %16 = arith.maximumf %14, %15 : vector<8x128xf32>
    %17 = arith.truncf %16 : vector<8x128xf32> to vector<8x128xbf16>
    %c0_12 = arith.constant 0 : index
    %c0_13 = arith.constant 0 : index
    %18 = vector.load %arg6[%c0_12, %c0_13] : memref<128x128xbf16, #tpu.memory_space<vmem>>, vector<128x128xbf16>
    %cst_14 = arith.constant dense<0.000000e+00> : vector<8x128xf32>
    %19 = tpu.matmul %17, %18, %cst_14 {dimension_numbers = #tpu.dot_dimension_numbers<[1], [0], [0], [1], [0, 0, 1, 1], [], []>} : vector<8x128xbf16>, vector<128x128xbf16>, vector<8x128xf32> -> vector<8x128xf32>
    %c0_15 = arith.constant 0 : index
    %c0_16 = arith.constant 0 : index
    %20 = vector.load %arg7[%c0_15, %c0_16] : memref<1x128xf32, #tpu.memory_space<vmem>>, vector<1x128xf32>
    %21 = vector.broadcast %20 : vector<1x128xf32> to vector<8x128xf32>
    %22 = arith.addf %19, %21 : vector<8x128xf32>
    %cst_17 = arith.constant 0.000000e+00 : f32
    %23 = vector.broadcast %cst_17 : f32 to vector<8x128xf32>
    %24 = arith.maximumf %22, %23 : vector<8x128xf32>
    %25 = arith.truncf %24 : vector<8x128xf32> to vector<8x128xbf16>
    %c0_18 = arith.constant 0 : index
    %c0_19 = arith.constant 0 : index
    %26 = vector.load %arg8[%c0_18, %c0_19] : memref<128x128xbf16, #tpu.memory_space<vmem>>, vector<128x128xbf16>
    %cst_20 = arith.constant dense<0.000000e+00> : vector<8x128xf32>
    %27 = tpu.matmul %25, %26, %cst_20 {dimension_numbers = #tpu.dot_dimension_numbers<[1], [0], [0], [1], [0, 0, 1, 1], [], []>} : vector<8x128xbf16>, vector<128x128xbf16>, vector<8x128xf32> -> vector<8x128xf32>
    %c0_21 = arith.constant 0 : index
    %c0_22 = arith.constant 0 : index
    %28 = vector.load %arg9[%c0_21, %c0_22] : memref<1x128xf32, #tpu.memory_space<vmem>>, vector<1x128xf32>
    %29 = vector.broadcast %28 : vector<1x128xf32> to vector<8x128xf32>
    %30 = arith.addf %27, %29 : vector<8x128xf32>
    %cst_23 = arith.constant 0.000000e+00 : f32
    %31 = vector.broadcast %cst_23 : f32 to vector<8x128xf32>
    %32 = arith.maximumf %30, %31 : vector<8x128xf32>
    %33 = arith.truncf %32 : vector<8x128xf32> to vector<8x128xbf16>
    %c0_24 = arith.constant 0 : index
    %c0_25 = arith.constant 0 : index
    %34 = vector.load %arg10[%c0_24, %c0_25] : memref<128x3xbf16, #tpu.memory_space<vmem>>, vector<128x3xbf16>
    %cst_26 = arith.constant dense<0.000000e+00> : vector<8x3xf32>
    %35 = tpu.matmul %33, %34, %cst_26 {dimension_numbers = #tpu.dot_dimension_numbers<[1], [0], [0], [1], [0, 0, 1, 1], [], []>} : vector<8x128xbf16>, vector<128x3xbf16>, vector<8x3xf32> -> vector<8x3xf32>
    %c0_27 = arith.constant 0 : index
    %c0_28 = arith.constant 0 : index
    %36 = vector.load %arg11[%c0_27, %c0_28] : memref<1x3xf32, #tpu.memory_space<vmem>>, vector<1x3xf32>
    %37 = vector.broadcast %36 : vector<1x3xf32> to vector<8x3xf32>
    %38 = arith.addf %35, %37 : vector<8x3xf32>
    %c0_29 = arith.constant 0 : index
    %c0_30 = arith.constant 0 : index
    %39 = vector.load %arg12[%c0_29, %c0_30] : memref<8x3xf32, #tpu.memory_space<vmem>>, vector<8x3xf32>
    tpu.vector_store %arg12[%c0_29, %c0_30], %38 {strides = array<i32>} : memref<8x3xf32, #tpu.memory_space<vmem>>, vector<8x3xf32>,
    return
  }
  func.func @transform_0(%arg0: i32) -> (i32, i32) {
    %c0_i32 = arith.constant 0 : i32
    %c0_i32_0 = arith.constant 0 : i32
    return %arg0, %c0_i32 : i32, i32
  }
  func.func @transform_1(%arg0: i32) -> (i32, i32) {
    %c0_i32 = arith.constant 0 : i32
    %c0_i32_0 = arith.constant 0 : i32
    %c0_i32_1 = arith.constant 0 : i32
    return %c0_i32, %c0_i32_0 : i32, i32
  }
  func.func @transform_2(%arg0: i32) -> (i32, i32) {
    %c0_i32 = arith.constant 0 : i32
    %c0_i32_0 = arith.constant 0 : i32
    %c0_i32_1 = arith.constant 0 : i32
    return %c0_i32, %c0_i32_0 : i32, i32
  }
  func.func @transform_3(%arg0: i32) -> (i32, i32) {
    %c0_i32 = arith.constant 0 : i32
    %c0_i32_0 = arith.constant 0 : i32
    %c0_i32_1 = arith.constant 0 : i32
    return %c0_i32, %c0_i32_0 : i32, i32
  }
  func.func @transform_4(%arg0: i32) -> (i32, i32) {
    %c0_i32 = arith.constant 0 : i32
    %c0_i32_0 = arith.constant 0 : i32
    %c0_i32_1 = arith.constant 0 : i32
    return %c0_i32, %c0_i32_0 : i32, i32
  }
  func.func @transform_5(%arg0: i32) -> (i32, i32) {
    %c0_i32 = arith.constant 0 : i32
    %c0_i32_0 = arith.constant 0 : i32
    %c0_i32_1 = arith.constant 0 : i32
    return %c0_i32, %c0_i32_0 : i32, i32
  }
  func.func @transform_6(%arg0: i32) -> (i32, i32) {
    %c0_i32 = arith.constant 0 : i32
    %c0_i32_0 = arith.constant 0 : i32
    %c0_i32_1 = arith.constant 0 : i32
    return %c0_i32, %c0_i32_0 : i32, i32
  }
  func.func @transform_7(%arg0: i32) -> (i32, i32) {
    %c0_i32 = arith.constant 0 : i32
    %c0_i32_0 = arith.constant 0 : i32
    %c0_i32_1 = arith.constant 0 : i32
    return %c0_i32, %c0_i32_0 : i32, i32
  }
  func.func @transform_8(%arg0: i32) -> (i32, i32) {
    %c0_i32 = arith.constant 0 : i32
    %c0_i32_0 = arith.constant 0 : i32
    %c0_i32_1 = arith.constant 0 : i32
    return %c0_i32, %c0_i32_0 : i32, i32
  }
  func.func @transform_9(%arg0: i32) -> (i32, i32) {
    %c0_i32 = arith.constant 0 : i32
    %c0_i32_0 = arith.constant 0 : i32
    %c0_i32_1 = arith.constant 0 : i32
    return %c0_i32, %c0_i32_0 : i32, i32
  }
  func.func @transform_10(%arg0: i32) -> (i32, i32) {
    %c0_i32 = arith.constant 0 : i32
    %c0_i32_0 = arith.constant 0 : i32
    %c0_i32_1 = arith.constant 0 : i32
    return %c0_i32, %c0_i32_0 : i32, i32
  }
  func.func @transform_11(%arg0: i32) -> (i32, i32) {
    %c0_i32 = arith.constant 0 : i32
    %c0_i32_0 = arith.constant 0 : i32
    return %arg0, %c0_i32 : i32, i32
  }
}

</mosaic_0001>

<bundles_post_ra>
// kernel: tpu_custom_call.1
= control target key start
LH: loop header
LB: loop body
LE: loop exit
PB: predicated region body
PF: predicated region fallthrough
CT: control target
= control target key end

     0   :  { %16 = vsyncpa [#allocation3], 0  ;;  %s1105_s0 = inlined_call_operand.hbm [shape: f32[8,10], index: 0, kind: input, shape index: {}]   ;;  %s1106_s1 = inlined_call_operand.hbm [shape: bf16[10,128], index: 1, kind: input, shape index: {}]   ;;  %s1107_s2 = inlined_call_operand.vmem [shape: f32[1,128], index: 2, kind: input, shape index: {}]   ;;  %s1108_s3 = inlined_call_operand.vmem [shape: bf16[128,128], index: 3, kind: input, shape index: {}]   ;;  %s1109_s4 = inlined_call_operand.vmem [shape: f32[1,128], index: 4, kind: input, shape index: {}]   ;;  %s1110_s5 = inlined_call_operand.hbm [shape: bf16[128,128], index: 5, kind: input, shape index: {}]   ;;  %s1111_s6 = inlined_call_operand.vmem [shape: f32[1,128], index: 6, kind: input, shape index: {}]   ;;  %s1112_s7 = inlined_call_operand.hbm [shape: bf16[128,128], index: 7, kind: input, shape index: {}]   ;;  %s1113_s8 = inlined_call_operand.vmem [shape: f32[1,128], index: 8, kind: input, shape index: {}]   ;;  %s1114_s9 = inlined_call_operand.vmem [shape: bf16[128,3], index: 9, kind: input, shape index: {}]   ;;  %s1115_s10 = inlined_call_operand.vmem [shape: f32[1,3], index: 10, kind: input, shape index: {}]   ;;  %s1116_s11 = inlined_call_operand.vmem [shape: f32[8,3], index: 11, kind: output, shape index: {}]  }
   0x1   :  { %17 = vsyncpa [#allocation5], 0 }
   0x2   :  { %18 = vsyncpa [#allocation8], 0  ;;  %s907_s17 = smov [#allocation4]  }
   0x3   :  { %s34_s18 = sshll.u32 %s907_s17, 4  ;;  %s35_s18 = int_to_ptr.vmem [resolvable:$true] %s34_s18 }
   0x4   :  { %s829_s19 = scalar_lea.vmem %s35_s18, 128  ;;  %p834_p1 = scmp.lt.s32.totalorder %s35_s18, %s35_s18 }
   0x5   :  { %p830_p0 = scmp.ne.s32.totalorder %s35_s18, %s829_s19  ;;  %p835_p2 = scmp.lt.s32.totalorder %s829_s19, %s829_s19 }
   0x7   :  { %p836_p3 = por %p835_p2, %p834_p1 }
   0x9   :  { %p837_p4 = pnand %p836_p3, %p830_p0 }
   0xb   :  { %840 = shalt.err (!%p837_p4)
}
   0xc   :  { %s908_s20 = smov 64   ;;  %s909_s21 = smov 4  }
   0xd   :  { %40 = dma.hbm_to_vmem [thread:$0]  %s1106_s1, 128, %s35_s18, [#allocation5], %s908_s20, %s908_s20, %s909_s21  }
   0xe   :  { %s910_s24 = smov [#allocation2]   ;;  %s911_s26 = smov [#allocation6]  }
   0xf   :  { %s25_s25 = sshll.u32 %s910_s24, 4  ;;  %s52_s27 = sshll.u32 %s911_s26, 4  ;;  %s26_s25 = int_to_ptr.vmem [resolvable:$true] %s25_s25  ;;  %s53_s27 = int_to_ptr.vmem [resolvable:$true] %s52_s27 }
  0x10   :  { %s849_s28 = scalar_lea.vmem %s26_s25, 128  ;;  %p854_p6 = scmp.lt.s32.totalorder %s26_s25, %s26_s25 }
  0x11   :  { %p850_p5 = scmp.ne.s32.totalorder %s26_s25, %s849_s28  ;;  %p855_p7 = scmp.lt.s32.totalorder %s849_s28, %s849_s28 }
  0x13   :  { %p856_p8 = por %p855_p7, %p854_p6 }
  0x15   :  { %p857_p9 = pnand %p856_p8, %p850_p5 }
  0x17   :  { %860 = shalt.err (!%p857_p9)
}
  0x18   :  { %28 = dma.hbm_to_vmem [thread:$0]  %s1105_s0, 128, %s26_s25, [#allocation3]  }
  0x19   :  { %s869_s12 = scalar_lea.vmem %s53_s27, 1024  ;;  %p874_p11 = scmp.lt.s32.totalorder %s53_s27, %s53_s27 }
  0x1a   :  { %p870_p10 = scmp.ne.s32.totalorder %s53_s27, %s869_s12  ;;  %p875_p12 = scmp.lt.s32.totalorder %s869_s12, %s869_s12 }
  0x1c   :  { %p876_p13 = por %p875_p12, %p874_p11 }
  0x1e   :  { %p877_p0 = pnand %p876_p13, %p870_p10 }
  0x20   :  { %880 = shalt.err (!%p877_p0)
}
  0x21   :  { %58 = dma.hbm_to_vmem [thread:$0]  %s1110_s5, 1024, %s53_s27, [#allocation5], %s908_s20, %s908_s20, %s909_s21  }
  0x22   :  { %s912_s14 = smov [#allocation7]  }
  0x23   :  { %s66_s15 = sshll.u32 %s912_s14, 4  ;;  %s67_s15 = int_to_ptr.vmem [resolvable:$true] %s66_s15 }
  0x24   :  { %s889_s16 = scalar_lea.vmem %s67_s15, 1024  ;;  %p894_p2 = scmp.lt.s32.totalorder %s67_s15, %s67_s15 }
  0x25   :  { %p890_p1 = scmp.ne.s32.totalorder %s67_s15, %s889_s16  ;;  %p895_p3 = scmp.lt.s32.totalorder %s889_s16, %s889_s16 }
  0x27   :  { %p896_p4 = por %p895_p3, %p894_p2 }
  0x29   :  { %p897_p5 = pnand %p896_p4, %p890_p1 }
  0x2b   :  { %900 = shalt.err (!%p897_p5)
}
  0x2c   :  { %72 = dma.hbm_to_vmem [thread:$0]  %s1112_s7, 1024, %s67_s15, [#allocation8], %s908_s20, %s908_s20, %s909_s21  }
  0x2d   :  { %901 = dma.done.wait [#allocation3], 128  }
  0x2e   :  { %902 = vsyncadd [#allocation3], 4294967168 }
  0x2f   :  { %903 = dma.done.wait [#allocation5], 1152  }
  0x30   :  { %904 = vsyncadd [#allocation5], 4294966144 }
  0x31   :  { %905 = dma.done.wait [#allocation8], 1024  }
  0x32   :  { %906 = vsyncadd [#allocation8], 4294966272  ;;  %v913_v0 = vmov 0.0   ;;  %vm914_vm0 = vmmov 0   ;;  %vm112_vm1 = vcmask 1044480   ;;  %v92_v2 = vld [vmem:[#allocation2] sm:$0xff] }
  0x33   :  { %694 = vmatprep.subr.bf16.mxu0 %v913_v0  ;;  %696 = vmatprep.mubr.msk.bf16.mxu0 %vm914_vm0, %v913_v0  ;;  %v788_v1 = vld [vmem:[#allocation4] sm:$0x1f]   ;;  %v93_v4 = vpack.c.bf16 %v92_v2, %v92_v2  ;;  %v789_v5 = vld [vmem:[%s1108_s3 + $0x38] sm:$0xff]   ;;  %vm108_vm2 = vcmask 80896   ;;  %v790_v6 = vld [vmem:[%s1108_s3 + $0x30] sm:$0xff]   ;;  %vm608_vm3 = vcmask 23552  }
  0x34   :  { %700 = vmatprep.subr.bf16.mxu1 %v913_v0  ;;  %716 = vmatprep.mubr.msk.bf16.mxu1 %vm914_vm0, %v913_v0  ;;  %v114_v3 = vsel %vm112_vm1, %v788_v1, 0  ;;  %v791_v7 = vld [vmem:[%s1108_s3 + $0x28] sm:$0xff]   ;;  %v792_v8 = vld [vmem:[%s1108_s3 + $0x20] sm:$0xff]   ;;  %v793_v9 = vld [vmem:[%s1108_s3 + $0x18] sm:$0xff]  }
  0x35   :  { %695 = vmatpush3.bf16.msra.mxu0 %v114_v3  ;;  %701 = vmatpush3.bf16.msra.mxu1 %v789_v5  ;;  %v794_v10 = vld [vmem:[%s1108_s3 + $0x10] sm:$0xff]   ;;  %v795_v11 = vld [vmem:[%s1108_s3 + $0x8] sm:$0xff]   ;;  %v796_v12 = vld [vmem:[%s1108_s3] sm:$0xff]  }
  0x36   :  { %720 = vmatprep.subr.bf16.mxu0 %v913_v0  ;;  %702 = vmatprep.subr.bf16.mxu1 %v913_v0  ;;  %v797_v13 = vld [vmem:[#allocation6 + $0x38] sm:$0xff]   ;;  %v798_v14 = vld [vmem:[#allocation6 + $0x30] sm:$0xff]   ;;  %v799_v15 = vld [vmem:[#allocation6 + $0x28] sm:$0xff]  }
  0x37   :  { %v800_v16 = vld [vmem:[#allocation6 + $0x20] sm:$0xff]   ;;  %v801_v17 = vld [vmem:[#allocation6 + $0x18] sm:$0xff]   ;;  %v802_v18 = vld [vmem:[#allocation6 + $0x10] sm:$0xff]  }
  0x38   :  { %697 = vmatmul.mubr.msk.bf16.vlgmr.msra.gmra.mxu0 %vm108_vm2, %v93_v4  ;;  %v617_v19 = vld [vmem:[%s1107_s2] ss:$0 sm:$0xff]  ;;  %v803_v27 = vld [vmem:[#allocation6 + $0x8] sm:$0xff]   ;;  %v804_v28 = vld [vmem:[#allocation6] sm:$0xff]  }
  0x39   :  { %736 = vmatprep.mubr.msk.bf16.mxu0 %vm914_vm0, %v913_v0  ;;  %703 = vmatpush3.bf16.msra.mxu1 %v790_v6  ;;  %v805_v29 = vld [vmem:[#allocation7 + $0x38] sm:$0xff]   ;;  %v806_v30 = vld [vmem:[#allocation7 + $0x30] sm:$0xff]   ;;  %v807_v31 = vld [vmem:[#allocation7 + $0x28] sm:$0xff]  }
  0x3a   :  { %704 = vmatprep.subr.bf16.mxu1 %v913_v0  ;;  %721 = vmatpush3.bf16.msra.mxu0 %v797_v13  ;;  %v808_v32 = vld [vmem:[#allocation7 + $0x20] sm:$0xff]   ;;  %v809_v33 = vld [vmem:[#allocation7 + $0x18] sm:$0xff]   ;;  %v810_v34 = vld [vmem:[#allocation7 + $0x10] sm:$0xff]  }
  0x3b   :  { %722 = vmatprep.subr.bf16.mxu0 %v913_v0  ;;  %v620_v35 = vld [vmem:[%s1109_s4] ss:$0 sm:$0xff]  ;;  %v811_v43 = vld [vmem:[#allocation7 + $0x8] sm:$0xff]   ;;  %v812_v44 = vld [vmem:[#allocation7] sm:$0xff]  }
  0x3c   :  { %v813_v45 = vld [vmem:[%s1114_s9 + $0x38] sm:$0xff]   ;;  %v814_v46 = vld [vmem:[%s1114_s9 + $0x30] sm:$0xff]   ;;  %v815_v47 = vld [vmem:[%s1114_s9 + $0x28] sm:$0xff]  }
  0x3d   :  { %705 = vmatpush3.bf16.msra.mxu1 %v791_v7  ;;  %v816_v48 = vld [vmem:[%s1114_s9 + $0x20] sm:$0xff]   ;;  %v817_v49 = vld [vmem:[%s1114_s9 + $0x18] sm:$0xff]   ;;  %v818_v50 = vld [vmem:[%s1114_s9 + $0x10] sm:$0xff]  }
  0x3e   :  { %706 = vmatprep.subr.bf16.mxu1 %v913_v0  ;;  %723 = vmatpush3.bf16.msra.mxu0 %v798_v14  ;;  %v629_v51 = vld [vmem:[%s1111_s6] ss:$0 sm:$0xff]  ;;  %v819_v59 = vld [vmem:[%s1114_s9 + $0x8] sm:$0xff]  }
  0x3f   :  { %724 = vmatprep.subr.bf16.mxu0 %v913_v0  ;;  %v820_v60 = vld [vmem:[%s1114_s9] sm:$0xff]  }
  0x40   :  { %v638_v61 = vld [vmem:[%s1113_s8] ss:$0 sm:$0xff] }
  0x41   :  { %707 = vmatpush3.bf16.msra.mxu1 %v792_v8 }
  0x42   :  { %708 = vmatprep.subr.bf16.mxu1 %v913_v0  ;;  %725 = vmatpush3.bf16.msra.mxu0 %v799_v15 }
  0x43   :  { %726 = vmatprep.subr.bf16.mxu0 %v913_v0 }
  0x45   :  { %709 = vmatpush3.bf16.msra.mxu1 %v793_v9 }
  0x46   :  { %710 = vmatprep.subr.bf16.mxu1 %v913_v0  ;;  %727 = vmatpush3.bf16.msra.mxu0 %v800_v16 }
  0x47   :  { %728 = vmatprep.subr.bf16.mxu0 %v913_v0 }
  0x49   :  { %711 = vmatpush3.bf16.msra.mxu1 %v794_v10 }
  0x4a   :  { %712 = vmatprep.subr.bf16.mxu1 %v913_v0  ;;  %729 = vmatpush3.bf16.msra.mxu0 %v801_v17 }
  0x4b   :  { %730 = vmatprep.subr.bf16.mxu0 %v913_v0 }
  0x4d   :  { %713 = vmatpush3.bf16.msra.mxu1 %v795_v11 }
  0x4e   :  { %714 = vmatprep.subr.bf16.mxu1 %v913_v0  ;;  %731 = vmatpush3.bf16.msra.mxu0 %v802_v18 }
  0x4f   :  { %732 = vmatprep.subr.bf16.mxu0 %v913_v0 }
  0x51   :  { %715 = vmatpush3.bf16.msra.mxu1 %v796_v12 }
  0x52   :  { %740 = vmatprep.subr.bf16.mxu1 %v913_v0  ;;  %733 = vmatpush3.bf16.msra.mxu0 %v803_v27 }
  0x53   :  { %734 = vmatprep.subr.bf16.mxu0 %v913_v0 }
  0x56   :  { %735 = vmatpush3.bf16.msra.mxu0 %v804_v28 }
  0x57   :  { %760 = vmatprep.subr.bf16.mxu0 %v913_v0 }
  0xf8   :  { %v150_v20 = vpop.f32.mrf.mxu0 }
  0xf9   :  { %v151_v21 = vadd.f32 %v617_v19, %v150_v20 }
  0xfa   :  { %v698_v22 = vpop.f32.mrf.mxu0 }
  0xfb   :  { %v156_v23 = vmax.f32 %v151_v21, 0.0 }
  0xfc   :  { %v153_v24 = vpop.f32.mrf.mxu0 }
  0xfd   :  { %v157_v25 = vpack.c.bf16 %v156_v23, %v156_v23 }
  0xfe   :  { %v699_v26 = vpop.f32.mrf.mxu0 }
  0xff   :  { %717 = vmatmul.mubr.bf16.vlgmr.msra.gmra.mxu1 %v157_v25 }
 0x100   :  { %756 = vmatprep.mubr.msk.bf16.mxu1 %vm914_vm0, %v913_v0  ;;  %741 = vmatpush3.bf16.msra.mxu1 %v805_v29 }
 0x101   :  { %742 = vmatprep.subr.bf16.mxu1 %v913_v0 }
 0x104   :  { %743 = vmatpush3.bf16.msra.mxu1 %v806_v30 }
 0x105   :  { %744 = vmatprep.subr.bf16.mxu1 %v913_v0 }
 0x108   :  { %745 = vmatpush3.bf16.msra.mxu1 %v807_v31 }
 0x109   :  { %746 = vmatprep.subr.bf16.mxu1 %v913_v0 }
 0x10c   :  { %747 = vmatpush3.bf16.msra.mxu1 %v808_v32 }
 0x10d   :  { %748 = vmatprep.subr.bf16.mxu1 %v913_v0 }
 0x110   :  { %749 = vmatpush3.bf16.msra.mxu1 %v809_v33 }
 0x111   :  { %750 = vmatprep.subr.bf16.mxu1 %v913_v0 }
 0x114   :  { %751 = vmatpush3.bf16.msra.mxu1 %v810_v34 }
 0x115   :  { %752 = vmatprep.subr.bf16.mxu1 %v913_v0 }
 0x118   :  { %753 = vmatpush3.bf16.msra.mxu1 %v811_v43 }
 0x119   :  { %754 = vmatprep.subr.bf16.mxu1 %v913_v0 }
 0x11c   :  { %755 = vmatpush3.bf16.msra.mxu1 %v812_v44 }
 0x1bf   :  { %v263_v36 = vpop.f32.mrf.mxu1 }
 0x1c0   :  { %v264_v37 = vadd.f32 %v620_v35, %v263_v36 }
 0x1c1   :  { %v718_v38 = vpop.f32.mrf.mxu1 }
 0x1c2   :  { %v269_v39 = vmax.f32 %v264_v37, 0.0 }
 0x1c3   :  { %v266_v40 = vpop.f32.mrf.mxu1 }
 0x1c4   :  { %v270_v41 = vpack.c.bf16 %v269_v39, %v269_v39 }
 0x1c5   :  { %v719_v42 = vpop.f32.mrf.mxu1 }
 0x1c6   :  { %737 = vmatmul.mubr.bf16.vlgmr.msra.gmra.mxu0 %v270_v41 }
 0x1c7   :  { %776 = vmatprep.mubr.msk.bf16.mxu0 %vm914_vm0, %v913_v0  ;;  %761 = vmatpush3.bf16.msra.mxu0 %v813_v45 }
 0x1c8   :  { %762 = vmatprep.subr.bf16.mxu0 %v913_v0 }
 0x1cb   :  { %763 = vmatpush3.bf16.msra.mxu0 %v814_v46 }
 0x1cc   :  { %764 = vmatprep.subr.bf16.mxu0 %v913_v0 }
 0x1cf   :  { %765 = vmatpush3.bf16.msra.mxu0 %v815_v47 }
 0x1d0   :  { %766 = vmatprep.subr.bf16.mxu0 %v913_v0 }
 0x1d3   :  { %767 = vmatpush3.bf16.msra.mxu0 %v816_v48 }
 0x1d4   :  { %768 = vmatprep.subr.bf16.mxu0 %v913_v0 }
 0x1d7   :  { %769 = vmatpush3.bf16.msra.mxu0 %v817_v49 }
 0x1d8   :  { %770 = vmatprep.subr.bf16.mxu0 %v913_v0 }
 0x1db   :  { %771 = vmatpush3.bf16.msra.mxu0 %v818_v50 }
 0x1dc   :  { %772 = vmatprep.subr.bf16.mxu0 %v913_v0 }
 0x1df   :  { %773 = vmatpush3.bf16.msra.mxu0 %v819_v59 }
 0x1e0   :  { %774 = vmatprep.subr.bf16.mxu0 %v913_v0  ;;  %v647_v0 = vld [vmem:[%s1115_s10] ss:$0 sm:$0xff] }
 0x1e3   :  { %775 = vmatpush3.bf16.msra.mxu0 %v820_v60 }
 0x286   :  { %v376_v52 = vpop.f32.mrf.mxu0 }
 0x287   :  { %v377_v53 = vadd.f32 %v629_v51, %v376_v52 }
 0x288   :  { %v738_v54 = vpop.f32.mrf.mxu0 }
 0x289   :  { %v382_v55 = vmax.f32 %v377_v53, 0.0 }
 0x28a   :  { %v379_v56 = vpop.f32.mrf.mxu0 }
 0x28b   :  { %v383_v57 = vpack.c.bf16 %v382_v55, %v382_v55 }
 0x28c   :  { %v739_v58 = vpop.f32.mrf.mxu0 }
 0x28d   :  { %757 = vmatmul.mubr.bf16.vlgmr.msra.gmra.mxu1 %v383_v57 }
 0x34d   :  { %v489_v62 = vpop.f32.mrf.mxu1 }
 0x34e   :  { %v490_v63 = vadd.f32 %v638_v61, %v489_v62 }
 0x34f   :  { %v758_v1 = vpop.f32.mrf.mxu1 }
 0x350   :  { %v495_v2 = vmax.f32 %v490_v63, 0.0 }
 0x351   :  { %v492_v3 = vpop.f32.mrf.mxu1 }
 0x352   :  { %v496_v4 = vpack.c.bf16 %v495_v2, %v495_v2 }
 0x353   :  { %v759_v5 = vpop.f32.mrf.mxu1 }
 0x354   :  { %777 = vmatmul.mubr.bf16.vlgmr.msra.gmra.mxu0 %v496_v4 }
 0x414   :  { %v602_v6 = vpop.f32.mrf.mxu0 }
 0x415   :  { %v603_v7 = vadd.f32 %v647_v0, %v602_v6 }
 0x416   :  { %v778_v8 = vpop.f32.mrf.mxu0 }
 0x417   :  { %609 = vst.msk [vmem:[%s1116_s11] sm:$0xff] %vm608_vm3, %v603_v7 }
 0x418   :  { %v605_v9 = vpop.f32.mrf.mxu0 }
 0x41a   :  { %v779_v10 = vpop.f32.mrf.mxu0 }
 0x41b   :  { %614 = vsyncpa [#allocation3], 1 }
 0x41c   :  { %615 = vsyncpa [#allocation5], 1 }
 0x41d   :  { %616 = vsyncpa [#allocation8], 1 }

</bundles_post_ra>
